<compile_context>
chip_gen: v7x
topology: tpu7x:2x2x1
jax: 0.10.0
libtpu: 0.0.40
codegen_flags: <defaults>
</compile_context>

<pallas_src>
import functools

import jax
import jax.numpy as jnp
import numpy as np
from jax import lax
from jax.experimental import pallas as pl
from jax.experimental.pallas import tpu as pltpu


def _largest_tile_rows(r_total, cap_rows):
    """Largest multiple-of-8 divisor of r_total that is <= cap_rows."""
    d = max(8, (cap_rows // 8) * 8)
    while d > 8:
        if r_total % d == 0:
            return d
        d -= 8
    return 8


def _choose_rows(r_total, n_batch, cap_rows, min_steps=4):
    """Pick the per-tile row count (rows of 128 lanes).

    Starts from the largest multiple-of-8 divisor of r_total under cap_rows
    (big tiles amortize the ~0.35us per-grid-step overhead), then shrinks if
    the total grid (n_batch * spatial_tiles) would have too few steps to keep
    both v7x TensorCores busy.
    """
    r = _largest_tile_rows(r_total, cap_rows)
    while n_batch * (r_total // r) < min_steps and r > 8:
        smaller = _largest_tile_rows(r_total, r - 8)
        if smaller == r:
            break
        r = smaller
    return r


def _vae_fwd_kernel(w_enc_ref, b_enc_ref, w_dec_ref, b_dec_ref,
                    x_ref, eps_ref, z_ref, xhat_ref, loss_ref,
                    *, c_in, z_ch, r_rows, hw_valid, need_mask):
    """One (batch element, spatial tile): encode -> sample -> decode -> losses.

    x_ref   : (c_in, R, 128)  input tile, channels on the leading axis
    eps_ref : (z_ch, R, 128)  standard-normal noise tile
    z_ref   : (z_ch, R, 128)  sampled latent tile (output)
    xhat_ref: (c_in, R, 128)  reconstruction tile (output)
    loss_ref: (1, 8, 128)     sublane/lane-broadcast per-tile loss partial

    Every per-channel block is a dense (R, 128) slab (full vreg density); the
    tiny channel contractions are unrolled scalar*vector FMAs on the VPU with
    the 1x1-conv weights read as scalars from SMEM (K=4 would waste the MXU).
    """
    f32 = jnp.float32
    x = x_ref[...].astype(f32)            # (c_in, R, 128)
    eps = eps_ref[...].astype(f32)        # (z_ch, R, 128)
    x_ch = [x[c] for c in range(c_in)]    # dense (R, 128) blocks

    # ---- encoder: fused mean/logvar heads. moments[j] = b[j] + sum_c w[j,c]*x[c]
    moments = []
    for j in range(2 * z_ch):
        acc = x_ch[0] * w_enc_ref[j, 0] + b_enc_ref[j]
        for c in range(1, c_in):
            acc = acc + x_ch[c] * w_enc_ref[j, c]
        moments.append(acc)

    # ---- DiagonalGaussianDistribution: clip logvar, reparameterized sample, KL
    z_blocks = []
    kl = None
    for j in range(z_ch):
        mean = moments[j]
        logvar = jnp.clip(moments[z_ch + j], -30.0, 20.0)
        std = jnp.exp(0.5 * logvar)        # one EUP exp; var = std*std
        zj = mean + std * eps[j]
        z_blocks.append(zj)
        z_ref[j] = zj.astype(z_ref.dtype)
        term = mean * mean + std * std - 1.0 - logvar
        kl = term if kl is None else kl + term

    # ---- decoder + sum-MSE: xhat[c] = b[c] + sum_j w_dec[c,j]*z[j]
    se = None
    for c in range(c_in):
        acc = z_blocks[0] * w_dec_ref[c, 0] + b_dec_ref[c]
        for j in range(1, z_ch):
            acc = acc + z_blocks[j] * w_dec_ref[c, j]
        xhat_ref[c] = acc.astype(xhat_ref.dtype)
        diff = acc - x_ch[c]
        sq = diff * diff
        se = sq if se is None else se + sq

    per_elem = se + 0.5 * kl               # (R, 128)

    if need_mask:
        # Zero the contribution of spatial padding (only emitted when H*W had
        # to be padded up to the tiled layout).
        s = pl.program_id(1)
        row = lax.broadcasted_iota(jnp.int32, (r_rows, 128), 0)
        lane = lax.broadcasted_iota(jnp.int32, (r_rows, 128), 1)
        flat = (s * r_rows + row) * 128 + lane
        per_elem = jnp.where(flat < hw_valid, per_elem, 0.0)

    partial = jnp.sum(per_elem)
    loss_ref[...] = jnp.full((1, 8, 128), partial, dtype=jnp.float32)


def base_vae_forward(x_nchw, params, eps_nzhw, *, tile_lanes=32768,
                     out_dtype=None):
    """Pallas implementation of BaseVAE.forward(x) -> (loss, z, x_hat).

    Encoder / decoder are 1x1 convolutions given by params:
      w_enc: (C, 2*Zc), b_enc: (2*Zc,), w_dec: (Zc, C), b_dec: (C,)
    eps_nzhw is the standard-normal noise used by posterior.sample().
    """
    N, C, H, W = x_nchw.shape
    Zc = params["w_dec"].shape[0]
    HW = H * W
    out_dtype = x_nchw.dtype if out_dtype is None else out_dtype

    # ---- spatial layout: pad H*W to a multiple of 1024 (8 sublanes x 128
    # lanes) and view each channel as dense (rows, 128) slabs.
    HW_pad = ((HW + 1023) // 1024) * 1024
    R_total = HW_pad // 128
    R = _choose_rows(R_total, N, max(8, tile_lanes // 128))
    S = R_total // R
    need_mask = bool(HW_pad != HW)

    # Free contiguous reshapes; no NCHW<->NHWC transposes, no dtype copies.
    x3 = x_nchw.reshape(N, C, HW)
    eps3 = eps_nzhw.reshape(N, Zc, HW)
    if need_mask:
        pad = ((0, 0), (0, 0), (0, HW_pad - HW))
        x3 = jnp.pad(x3, pad)
        eps3 = jnp.pad(eps3, pad)
    x4 = x3.reshape(N, C, R_total, 128)
    eps4 = eps3.reshape(N, Zc, R_total, 128)

    # Tiny 1x1-conv weights, pre-transposed to (out_channel, in_channel).
    # Full-array SMEM operands: resident before the grid runs, no per-step DMA.
    w_enc_t = params["w_enc"].T.astype(jnp.float32)   # (2*Zc, C)
    b_enc = params["b_enc"].astype(jnp.float32)       # (2*Zc,)
    w_dec_t = params["w_dec"].T.astype(jnp.float32)   # (C, Zc)
    b_dec = params["b_dec"].astype(jnp.float32)       # (C,)

    smem_spec = pl.BlockSpec(memory_space=pltpu.MemorySpace.SMEM)
    kernel = functools.partial(
        _vae_fwd_kernel, c_in=C, z_ch=Zc, r_rows=R, hw_valid=HW,
        need_mask=need_mask)

    M = N * HW_pad
    in_bytes = int(x4.dtype.itemsize) * M * (C + Zc)
    out_bytes = int(jnp.dtype(out_dtype).itemsize) * M * (C + Zc)
    cost = pl.CostEstimate(
        flops=int(M * (4 * C * Zc + 14 * Zc + 4 * C)),
        transcendentals=int(M * Zc),
        bytes_accessed=int(in_bytes + out_bytes),
    )

    z4, xhat4, loss_part = pl.pallas_call(
        kernel,
        grid=(N, S),
        in_specs=[
            smem_spec, smem_spec, smem_spec, smem_spec,            # weights/biases
            pl.BlockSpec((None, C, R, 128), lambda n, s: (n, 0, s, 0)),   # x
            pl.BlockSpec((None, Zc, R, 128), lambda n, s: (n, 0, s, 0)),  # eps
        ],
        out_specs=[
            pl.BlockSpec((None, Zc, R, 128), lambda n, s: (n, 0, s, 0)),  # z
            pl.BlockSpec((None, C, R, 128), lambda n, s: (n, 0, s, 0)),   # x_hat
            pl.BlockSpec((None, 1, 8, 128), lambda n, s: (n, s, 0, 0)),   # loss
        ],
        out_shape=[
            jax.ShapeDtypeStruct((N, Zc, R_total, 128), out_dtype),
            jax.ShapeDtypeStruct((N, C, R_total, 128), out_dtype),
            jax.ShapeDtypeStruct((N, S, 8, 128), jnp.float32),
        ],
        compiler_params=pltpu.CompilerParams(
            dimension_semantics=("parallel", "parallel"),
            vmem_limit_bytes=32 * 1024 * 1024),
        cost_estimate=cost,
    )(w_enc_t, b_enc, w_dec_t, b_dec, x4, eps4)

    z = z4.reshape(N, Zc, HW_pad)[:, :, :HW].reshape(N, Zc, H, W)
    x_hat = xhat4.reshape(N, C, HW_pad)[:, :, :HW].reshape(N, C, H, W)
    loss = jnp.sum(loss_part[:, :, 0, 0]) / N
    return loss, z, x_hat


def _reference_forward(x_nchw, params, eps_nzhw):
    """Plain-JAX reference mirroring the PyTorch semantics (for checking)."""
    N, C, H, W = x_nchw.shape
    Zc = params["w_dec"].shape[0]
    x2d = jnp.transpose(x_nchw, (0, 2, 3, 1)).reshape(-1, C)
    eps2d = jnp.transpose(eps_nzhw, (0, 2, 3, 1)).reshape(-1, Zc)
    moments = x2d @ params["w_enc"] + params["b_enc"]
    mean, logvar = moments[:, :Zc], jnp.clip(moments[:, Zc:], -30.0, 20.0)
    z2d = mean + jnp.exp(0.5 * logvar) * eps2d
    xhat2d = z2d @ params["w_dec"] + params["b_dec"]
    l1 = jnp.sum((xhat2d - x2d) ** 2)
    kl = 0.5 * jnp.sum(mean ** 2 + jnp.exp(logvar) - 1.0 - logvar)
    z = jnp.transpose(z2d.reshape(N, H, W, Zc), (0, 3, 1, 2))
    x_hat = jnp.transpose(xhat2d.reshape(N, H, W, C), (0, 3, 1, 2))
    return (l1 + kl) / N, z, x_hat


if __name__ == "__main__":
    # Small shapes consistent with the module: NCHW input, latent channels Zc.
    N, C, H, W = 2, 4, 16, 16
    Zc = 4                                    # encoder emits 2*Zc moment channels

    key = jax.random.PRNGKey(0)
    kx, keps, kwe, kwd = jax.random.split(key, 4)

    x = jax.random.normal(kx, (N, C, H, W), dtype=jnp.float32)
    eps = jax.random.normal(keps, (N, Zc, H, W), dtype=jnp.float32)

    # Deterministic synthetic 1x1-conv encoder / decoder parameters.
    params = {
        "w_enc": 0.1 * jax.random.normal(kwe, (C, 2 * Zc), dtype=jnp.float32),
        "b_enc": jnp.linspace(-0.05, 0.05, 2 * Zc, dtype=jnp.float32),
        "w_dec": 0.1 * jax.random.normal(kwd, (Zc, C), dtype=jnp.float32),
        "b_dec": jnp.linspace(-0.02, 0.02, C, dtype=jnp.float32),
    }

    loss, z, x_hat = jax.block_until_ready(
        jax.jit(base_vae_forward)(x, params, eps))

    # Numerical sanity check against a plain-JAX reference.
    loss_ref, z_ref, xhat_ref = _reference_forward(x, params, eps)
    np.testing.assert_allclose(np.asarray(loss), np.asarray(loss_ref),
                               rtol=1e-3, atol=1e-3)
    np.testing.assert_allclose(np.asarray(z), np.asarray(z_ref),
                               rtol=1e-3, atol=1e-3)
    np.testing.assert_allclose(np.asarray(x_hat), np.asarray(xhat_ref),
                               rtol=1e-3, atol=1e-3)
    assert z.shape == (N, Zc, H, W) and x_hat.shape == (N, C, H, W)

    # TODO(synk): visualize_latent / visualize_noise early-return branches and
    # .sample(noise) are intermediate products of the same kernel (moments / z /
    # decoder FMA) and are not wired as separate entry points.
    print("KERNEL_OK")
</pallas_src>

<mosaic_0001>
module attributes {stable_mosaic.version = 11 : i64} {
  func.func @_vae_fwd_kernel(%arg0: i32, %arg1: i32, %arg2: memref<8x4xf32, #tpu.memory_space<smem>>, %arg3: memref<8xf32, #tpu.memory_space<smem>>, %arg4: memref<4x4xf32, #tpu.memory_space<smem>>, %arg5: memref<4xf32, #tpu.memory_space<smem>>, %arg6: memref<1x4x8x128xf32, #tpu.memory_space<vmem>>, %arg7: memref<1x4x8x128xf32, #tpu.memory_space<vmem>>, %arg8: memref<1x4x8x128xf32, #tpu.memory_space<vmem>>, %arg9: memref<1x4x8x128xf32, #tpu.memory_space<vmem>>, %arg10: memref<1x1x8x128xf32, #tpu.memory_space<vmem>>) attributes {dimension_semantics = [#tpu.dimension_semantics<parallel>, #tpu.dimension_semantics<parallel>], iteration_bounds = array<i64: 2, 1>, scalar_prefetch = 0 : i64, scratch_operands = 0 : i64, tpu.core_type = #tpu.core_type<tc>, window_params = [{transform_indices = @transform_0, window_bounds = array<i64: 8, 4>}, {transform_indices = @transform_1, window_bounds = array<i64: 8>}, {transform_indices = @transform_2, window_bounds = array<i64: 4, 4>}, {transform_indices = @transform_3, window_bounds = array<i64: 4>}, {transform_indices = @transform_4, window_bounds = array<i64: 1, 4, 8, 128>}, {transform_indices = @transform_5, window_bounds = array<i64: 1, 4, 8, 128>}, {transform_indices = @transform_6, window_bounds = array<i64: 1, 4, 8, 128>}, {transform_indices = @transform_7, window_bounds = array<i64: 1, 4, 8, 128>}, {transform_indices = @transform_8, window_bounds = array<i64: 1, 1, 8, 128>}]} {
    %c0 = arith.constant 0 : index
    %c0_0 = arith.constant 0 : index
    %c0_1 = arith.constant 0 : index
    %c0_2 = arith.constant 0 : index
    %0 = vector.load %arg6[%c0, %c0_0, %c0_1, %c0_2] : memref<1x4x8x128xf32, #tpu.memory_space<vmem>>, vector<1x4x8x128xf32>
    %1 = vector.shape_cast %0 : vector<1x4x8x128xf32> to vector<4x8x128xf32>
    %c0_3 = arith.constant 0 : index
    %c0_4 = arith.constant 0 : index
    %c0_5 = arith.constant 0 : index
    %c0_6 = arith.constant 0 : index
    %2 = vector.load %arg7[%c0_3, %c0_4, %c0_5, %c0_6] : memref<1x4x8x128xf32, #tpu.memory_space<vmem>>, vector<1x4x8x128xf32>
    %3 = vector.shape_cast %2 : vector<1x4x8x128xf32> to vector<4x8x128xf32>
    %4 = vector.extract_strided_slice %1 {offsets = [0, 0, 0], sizes = [1, 8, 128], strides = [1, 1, 1]} : vector<4x8x128xf32> to vector<1x8x128xf32>
    %5 = vector.shape_cast %4 : vector<1x8x128xf32> to vector<8x128xf32>
    %6 = vector.extract_strided_slice %1 {offsets = [1, 0, 0], sizes = [1, 8, 128], strides = [1, 1, 1]} : vector<4x8x128xf32> to vector<1x8x128xf32>
    %7 = vector.shape_cast %6 : vector<1x8x128xf32> to vector<8x128xf32>
    %8 = vector.extract_strided_slice %1 {offsets = [2, 0, 0], sizes = [1, 8, 128], strides = [1, 1, 1]} : vector<4x8x128xf32> to vector<1x8x128xf32>
    %9 = vector.shape_cast %8 : vector<1x8x128xf32> to vector<8x128xf32>
    %10 = vector.extract_strided_slice %1 {offsets = [3, 0, 0], sizes = [1, 8, 128], strides = [1, 1, 1]} : vector<4x8x128xf32> to vector<1x8x128xf32>
    %11 = vector.shape_cast %10 : vector<1x8x128xf32> to vector<8x128xf32>
    %c0_7 = arith.constant 0 : index
    %c0_8 = arith.constant 0 : index
    %12 = memref.load %arg2[%c0_7, %c0_8] : memref<8x4xf32, #tpu.memory_space<smem>>
    %13 = vector.broadcast %12 : f32 to vector<8x128xf32>
    %14 = arith.mulf %5, %13 : vector<8x128xf32>
    %c0_9 = arith.constant 0 : index
    %15 = memref.load %arg3[%c0_9] : memref<8xf32, #tpu.memory_space<smem>>
    %16 = vector.broadcast %15 : f32 to vector<8x128xf32>
    %17 = arith.addf %14, %16 : vector<8x128xf32>
    %c0_10 = arith.constant 0 : index
    %c1 = arith.constant 1 : index
    %18 = memref.load %arg2[%c0_10, %c1] : memref<8x4xf32, #tpu.memory_space<smem>>
    %19 = vector.broadcast %18 : f32 to vector<8x128xf32>
    %20 = arith.mulf %7, %19 : vector<8x128xf32>
    %21 = arith.addf %17, %20 : vector<8x128xf32>
    %c0_11 = arith.constant 0 : index
    %c2 = arith.constant 2 : index
    %22 = memref.load %arg2[%c0_11, %c2] : memref<8x4xf32, #tpu.memory_space<smem>>
    %23 = vector.broadcast %22 : f32 to vector<8x128xf32>
    %24 = arith.mulf %9, %23 : vector<8x128xf32>
    %25 = arith.addf %21, %24 : vector<8x128xf32>
    %c0_12 = arith.constant 0 : index
    %c3 = arith.constant 3 : index
    %26 = memref.load %arg2[%c0_12, %c3] : memref<8x4xf32, #tpu.memory_space<smem>>
    %27 = vector.broadcast %26 : f32 to vector<8x128xf32>
    %28 = arith.mulf %11, %27 : vector<8x128xf32>
    %29 = arith.addf %25, %28 : vector<8x128xf32>
    %c1_13 = arith.constant 1 : index
    %c0_14 = arith.constant 0 : index
    %30 = memref.load %arg2[%c1_13, %c0_14] : memref<8x4xf32, #tpu.memory_space<smem>>
    %31 = vector.broadcast %30 : f32 to vector<8x128xf32>
    %32 = arith.mulf %5, %31 : vector<8x128xf32>
    %c1_15 = arith.constant 1 : index
    %33 = memref.load %arg3[%c1_15] : memref<8xf32, #tpu.memory_space<smem>>
    %34 = vector.broadcast %33 : f32 to vector<8x128xf32>
    %35 = arith.addf %32, %34 : vector<8x128xf32>
    %c1_16 = arith.constant 1 : index
    %c1_17 = arith.constant 1 : index
    %36 = memref.load %arg2[%c1_16, %c1_17] : memref<8x4xf32, #tpu.memory_space<smem>>
    %37 = vector.broadcast %36 : f32 to vector<8x128xf32>
    %38 = arith.mulf %7, %37 : vector<8x128xf32>
    %39 = arith.addf %35, %38 : vector<8x128xf32>
    %c1_18 = arith.constant 1 : index
    %c2_19 = arith.constant 2 : index
    %40 = memref.load %arg2[%c1_18, %c2_19] : memref<8x4xf32, #tpu.memory_space<smem>>
    %41 = vector.broadcast %40 : f32 to vector<8x128xf32>
    %42 = arith.mulf %9, %41 : vector<8x128xf32>
    %43 = arith.addf %39, %42 : vector<8x128xf32>
    %c1_20 = arith.constant 1 : index
    %c3_21 = arith.constant 3 : index
    %44 = memref.load %arg2[%c1_20, %c3_21] : memref<8x4xf32, #tpu.memory_space<smem>>
    %45 = vector.broadcast %44 : f32 to vector<8x128xf32>
    %46 = arith.mulf %11, %45 : vector<8x128xf32>
    %47 = arith.addf %43, %46 : vector<8x128xf32>
    %c2_22 = arith.constant 2 : index
    %c0_23 = arith.constant 0 : index
    %48 = memref.load %arg2[%c2_22, %c0_23] : memref<8x4xf32, #tpu.memory_space<smem>>
    %49 = vector.broadcast %48 : f32 to vector<8x128xf32>
    %50 = arith.mulf %5, %49 : vector<8x128xf32>
    %c2_24 = arith.constant 2 : index
    %51 = memref.load %arg3[%c2_24] : memref<8xf32, #tpu.memory_space<smem>>
    %52 = vector.broadcast %51 : f32 to vector<8x128xf32>
    %53 = arith.addf %50, %52 : vector<8x128xf32>
    %c2_25 = arith.constant 2 : index
    %c1_26 = arith.constant 1 : index
    %54 = memref.load %arg2[%c2_25, %c1_26] : memref<8x4xf32, #tpu.memory_space<smem>>
    %55 = vector.broadcast %54 : f32 to vector<8x128xf32>
    %56 = arith.mulf %7, %55 : vector<8x128xf32>
    %57 = arith.addf %53, %56 : vector<8x128xf32>
    %c2_27 = arith.constant 2 : index
    %c2_28 = arith.constant 2 : index
    %58 = memref.load %arg2[%c2_27, %c2_28] : memref<8x4xf32, #tpu.memory_space<smem>>
    %59 = vector.broadcast %58 : f32 to vector<8x128xf32>
    %60 = arith.mulf %9, %59 : vector<8x128xf32>
    %61 = arith.addf %57, %60 : vector<8x128xf32>
    %c2_29 = arith.constant 2 : index
    %c3_30 = arith.constant 3 : index
    %62 = memref.load %arg2[%c2_29, %c3_30] : memref<8x4xf32, #tpu.memory_space<smem>>
    %63 = vector.broadcast %62 : f32 to vector<8x128xf32>
    %64 = arith.mulf %11, %63 : vector<8x128xf32>
    %65 = arith.addf %61, %64 : vector<8x128xf32>
    %c3_31 = arith.constant 3 : index
    %c0_32 = arith.constant 0 : index
    %66 = memref.load %arg2[%c3_31, %c0_32] : memref<8x4xf32, #tpu.memory_space<smem>>
    %67 = vector.broadcast %66 : f32 to vector<8x128xf32>
    %68 = arith.mulf %5, %67 : vector<8x128xf32>
    %c3_33 = arith.constant 3 : index
    %69 = memref.load %arg3[%c3_33] : memref<8xf32, #tpu.memory_space<smem>>
    %70 = vector.broadcast %69 : f32 to vector<8x128xf32>
    %71 = arith.addf %68, %70 : vector<8x128xf32>
    %c3_34 = arith.constant 3 : index
    %c1_35 = arith.constant 1 : index
    %72 = memref.load %arg2[%c3_34, %c1_35] : memref<8x4xf32, #tpu.memory_space<smem>>
    %73 = vector.broadcast %72 : f32 to vector<8x128xf32>
    %74 = arith.mulf %7, %73 : vector<8x128xf32>
    %75 = arith.addf %71, %74 : vector<8x128xf32>
    %c3_36 = arith.constant 3 : index
    %c2_37 = arith.constant 2 : index
    %76 = memref.load %arg2[%c3_36, %c2_37] : memref<8x4xf32, #tpu.memory_space<smem>>
    %77 = vector.broadcast %76 : f32 to vector<8x128xf32>
    %78 = arith.mulf %9, %77 : vector<8x128xf32>
    %79 = arith.addf %75, %78 : vector<8x128xf32>
    %c3_38 = arith.constant 3 : index
    %c3_39 = arith.constant 3 : index
    %80 = memref.load %arg2[%c3_38, %c3_39] : memref<8x4xf32, #tpu.memory_space<smem>>
    %81 = vector.broadcast %80 : f32 to vector<8x128xf32>
    %82 = arith.mulf %11, %81 : vector<8x128xf32>
    %83 = arith.addf %79, %82 : vector<8x128xf32>
    %c4 = arith.constant 4 : index
    %c0_40 = arith.constant 0 : index
    %84 = memref.load %arg2[%c4, %c0_40] : memref<8x4xf32, #tpu.memory_space<smem>>
    %85 = vector.broadcast %84 : f32 to vector<8x128xf32>
    %86 = arith.mulf %5, %85 : vector<8x128xf32>
    %c4_41 = arith.constant 4 : index
    %87 = memref.load %arg3[%c4_41] : memref<8xf32, #tpu.memory_space<smem>>
    %88 = vector.broadcast %87 : f32 to vector<8x128xf32>
    %89 = arith.addf %86, %88 : vector<8x128xf32>
    %c4_42 = arith.constant 4 : index
    %c1_43 = arith.constant 1 : index
    %90 = memref.load %arg2[%c4_42, %c1_43] : memref<8x4xf32, #tpu.memory_space<smem>>
    %91 = vector.broadcast %90 : f32 to vector<8x128xf32>
    %92 = arith.mulf %7, %91 : vector<8x128xf32>
    %93 = arith.addf %89, %92 : vector<8x128xf32>
    %c4_44 = arith.constant 4 : index
    %c2_45 = arith.constant 2 : index
    %94 = memref.load %arg2[%c4_44, %c2_45] : memref<8x4xf32, #tpu.memory_space<smem>>
    %95 = vector.broadcast %94 : f32 to vector<8x128xf32>
    %96 = arith.mulf %9, %95 : vector<8x128xf32>
    %97 = arith.addf %93, %96 : vector<8x128xf32>
    %c4_46 = arith.constant 4 : index
    %c3_47 = arith.constant 3 : index
    %98 = memref.load %arg2[%c4_46, %c3_47] : memref<8x4xf32, #tpu.memory_space<smem>>
    %99 = vector.broadcast %98 : f32 to vector<8x128xf32>
    %100 = arith.mulf %11, %99 : vector<8x128xf32>
    %101 = arith.addf %97, %100 : vector<8x128xf32>
    %c5 = arith.constant 5 : index
    %c0_48 = arith.constant 0 : index
    %102 = memref.load %arg2[%c5, %c0_48] : memref<8x4xf32, #tpu.memory_space<smem>>
    %103 = vector.broadcast %102 : f32 to vector<8x128xf32>
    %104 = arith.mulf %5, %103 : vector<8x128xf32>
    %c5_49 = arith.constant 5 : index
    %105 = memref.load %arg3[%c5_49] : memref<8xf32, #tpu.memory_space<smem>>
    %106 = vector.broadcast %105 : f32 to vector<8x128xf32>
    %107 = arith.addf %104, %106 : vector<8x128xf32>
    %c5_50 = arith.constant 5 : index
    %c1_51 = arith.constant 1 : index
    %108 = memref.load %arg2[%c5_50, %c1_51] : memref<8x4xf32, #tpu.memory_space<smem>>
    %109 = vector.broadcast %108 : f32 to vector<8x128xf32>
    %110 = arith.mulf %7, %109 : vector<8x128xf32>
    %111 = arith.addf %107, %110 : vector<8x128xf32>
    %c5_52 = arith.constant 5 : index
    %c2_53 = arith.constant 2 : index
    %112 = memref.load %arg2[%c5_52, %c2_53] : memref<8x4xf32, #tpu.memory_space<smem>>
    %113 = vector.broadcast %112 : f32 to vector<8x128xf32>
    %114 = arith.mulf %9, %113 : vector<8x128xf32>
    %115 = arith.addf %111, %114 : vector<8x128xf32>
    %c5_54 = arith.constant 5 : index
    %c3_55 = arith.constant 3 : index
    %116 = memref.load %arg2[%c5_54, %c3_55] : memref<8x4xf32, #tpu.memory_space<smem>>
    %117 = vector.broadcast %116 : f32 to vector<8x128xf32>
    %118 = arith.mulf %11, %117 : vector<8x128xf32>
    %119 = arith.addf %115, %118 : vector<8x128xf32>
    %c6 = arith.constant 6 : index
    %c0_56 = arith.constant 0 : index
    %120 = memref.load %arg2[%c6, %c0_56] : memref<8x4xf32, #tpu.memory_space<smem>>
    %121 = vector.broadcast %120 : f32 to vector<8x128xf32>
    %122 = arith.mulf %5, %121 : vector<8x128xf32>
    %c6_57 = arith.constant 6 : index
    %123 = memref.load %arg3[%c6_57] : memref<8xf32, #tpu.memory_space<smem>>
    %124 = vector.broadcast %123 : f32 to vector<8x128xf32>
    %125 = arith.addf %122, %124 : vector<8x128xf32>
    %c6_58 = arith.constant 6 : index
    %c1_59 = arith.constant 1 : index
    %126 = memref.load %arg2[%c6_58, %c1_59] : memref<8x4xf32, #tpu.memory_space<smem>>
    %127 = vector.broadcast %126 : f32 to vector<8x128xf32>
    %128 = arith.mulf %7, %127 : vector<8x128xf32>
    %129 = arith.addf %125, %128 : vector<8x128xf32>
    %c6_60 = arith.constant 6 : index
    %c2_61 = arith.constant 2 : index
    %130 = memref.load %arg2[%c6_60, %c2_61] : memref<8x4xf32, #tpu.memory_space<smem>>
    %131 = vector.broadcast %130 : f32 to vector<8x128xf32>
    %132 = arith.mulf %9, %131 : vector<8x128xf32>
    %133 = arith.addf %129, %132 : vector<8x128xf32>
    %c6_62 = arith.constant 6 : index
    %c3_63 = arith.constant 3 : index
    %134 = memref.load %arg2[%c6_62, %c3_63] : memref<8x4xf32, #tpu.memory_space<smem>>
    %135 = vector.broadcast %134 : f32 to vector<8x128xf32>
    %136 = arith.mulf %11, %135 : vector<8x128xf32>
    %137 = arith.addf %133, %136 : vector<8x128xf32>
    %c7 = arith.constant 7 : index
    %c0_64 = arith.constant 0 : index
    %138 = memref.load %arg2[%c7, %c0_64] : memref<8x4xf32, #tpu.memory_space<smem>>
    %139 = vector.broadcast %138 : f32 to vector<8x128xf32>
    %140 = arith.mulf %5, %139 : vector<8x128xf32>
    %c7_65 = arith.constant 7 : index
    %141 = memref.load %arg3[%c7_65] : memref<8xf32, #tpu.memory_space<smem>>
    %142 = vector.broadcast %141 : f32 to vector<8x128xf32>
    %143 = arith.addf %140, %142 : vector<8x128xf32>
    %c7_66 = arith.constant 7 : index
    %c1_67 = arith.constant 1 : index
    %144 = memref.load %arg2[%c7_66, %c1_67] : memref<8x4xf32, #tpu.memory_space<smem>>
    %145 = vector.broadcast %144 : f32 to vector<8x128xf32>
    %146 = arith.mulf %7, %145 : vector<8x128xf32>
    %147 = arith.addf %143, %146 : vector<8x128xf32>
    %c7_68 = arith.constant 7 : index
    %c2_69 = arith.constant 2 : index
    %148 = memref.load %arg2[%c7_68, %c2_69] : memref<8x4xf32, #tpu.memory_space<smem>>
    %149 = vector.broadcast %148 : f32 to vector<8x128xf32>
    %150 = arith.mulf %9, %149 : vector<8x128xf32>
    %151 = arith.addf %147, %150 : vector<8x128xf32>
    %c7_70 = arith.constant 7 : index
    %c3_71 = arith.constant 3 : index
    %152 = memref.load %arg2[%c7_70, %c3_71] : memref<8x4xf32, #tpu.memory_space<smem>>
    %153 = vector.broadcast %152 : f32 to vector<8x128xf32>
    %154 = arith.mulf %11, %153 : vector<8x128xf32>
    %155 = arith.addf %151, %154 : vector<8x128xf32>
    %cst = arith.constant -3.000000e+01 : f32
    %cst_72 = arith.constant 2.000000e+01 : f32
    %156 = vector.broadcast %cst : f32 to vector<8x128xf32>
    %157 = arith.maximumf %156, %101 : vector<8x128xf32>
    %158 = vector.broadcast %cst_72 : f32 to vector<8x128xf32>
    %159 = arith.minimumf %158, %157 : vector<8x128xf32>
    %cst_73 = arith.constant 5.000000e-01 : f32
    %160 = vector.broadcast %cst_73 : f32 to vector<8x128xf32>
    %161 = arith.mulf %160, %159 : vector<8x128xf32>
    %162 = math.exp %161 : vector<8x128xf32>
    %163 = vector.extract_strided_slice %3 {offsets = [0, 0, 0], sizes = [1, 8, 128], strides = [1, 1, 1]} : vector<4x8x128xf32> to vector<1x8x128xf32>
    %164 = vector.shape_cast %163 : vector<1x8x128xf32> to vector<8x128xf32>
    %165 = arith.mulf %162, %164 : vector<8x128xf32>
    %166 = arith.addf %29, %165 : vector<8x128xf32>
    %c0_74 = arith.constant 0 : index
    %c0_75 = arith.constant 0 : index
    %c0_76 = arith.constant 0 : index
    %c0_77 = arith.constant 0 : index
    %167 = vector.load %arg8[%c0_74, %c0_75, %c0_76, %c0_77] : memref<1x4x8x128xf32, #tpu.memory_space<vmem>>, vector<1x1x8x128xf32>
    %168 = vector.shape_cast %167 : vector<1x1x8x128xf32> to vector<8x128xf32>
    %169 = vector.shape_cast %166 : vector<8x128xf32> to vector<1x1x8x128xf32>
    tpu.vector_store %arg8[%c0_74, %c0_75, %c0_76, %c0_77], %169 {strides = array<i32>} : memref<1x4x8x128xf32, #tpu.memory_space<vmem>>, vector<1x1x8x128xf32>,
    %170 = arith.mulf %29, %29 : vector<8x128xf32>
    %171 = arith.mulf %162, %162 : vector<8x128xf32>
    %172 = arith.addf %170, %171 : vector<8x128xf32>
    %cst_78 = arith.constant 1.000000e+00 : f32
    %173 = vector.broadcast %cst_78 : f32 to vector<8x128xf32>
    %174 = arith.subf %172, %173 : vector<8x128xf32>
    %175 = arith.subf %174, %159 : vector<8x128xf32>
    %cst_79 = arith.constant -3.000000e+01 : f32
    %cst_80 = arith.constant 2.000000e+01 : f32
    %176 = vector.broadcast %cst_79 : f32 to vector<8x128xf32>
    %177 = arith.maximumf %176, %119 : vector<8x128xf32>
    %178 = vector.broadcast %cst_80 : f32 to vector<8x128xf32>
    %179 = arith.minimumf %178, %177 : vector<8x128xf32>
    %cst_81 = arith.constant 5.000000e-01 : f32
    %180 = vector.broadcast %cst_81 : f32 to vector<8x128xf32>
    %181 = arith.mulf %180, %179 : vector<8x128xf32>
    %182 = math.exp %181 : vector<8x128xf32>
    %183 = vector.extract_strided_slice %3 {offsets = [1, 0, 0], sizes = [1, 8, 128], strides = [1, 1, 1]} : vector<4x8x128xf32> to vector<1x8x128xf32>
    %184 = vector.shape_cast %183 : vector<1x8x128xf32> to vector<8x128xf32>
    %185 = arith.mulf %182, %184 : vector<8x128xf32>
    %186 = arith.addf %47, %185 : vector<8x128xf32>
    %c0_82 = arith.constant 0 : index
    %c1_83 = arith.constant 1 : index
    %c0_84 = arith.constant 0 : index
    %c0_85 = arith.constant 0 : index
    %187 = vector.load %arg8[%c0_82, %c1_83, %c0_84, %c0_85] : memref<1x4x8x128xf32, #tpu.memory_space<vmem>>, vector<1x1x8x128xf32>
    %188 = vector.shape_cast %187 : vector<1x1x8x128xf32> to vector<8x128xf32>
    %189 = vector.shape_cast %186 : vector<8x128xf32> to vector<1x1x8x128xf32>
    tpu.vector_store %arg8[%c0_82, %c1_83, %c0_84, %c0_85], %189 {strides = array<i32>} : memref<1x4x8x128xf32, #tpu.memory_space<vmem>>, vector<1x1x8x128xf32>,
    %190 = arith.mulf %47, %47 : vector<8x128xf32>
    %191 = arith.mulf %182, %182 : vector<8x128xf32>
    %192 = arith.addf %190, %191 : vector<8x128xf32>
    %cst_86 = arith.constant 1.000000e+00 : f32
    %193 = vector.broadcast %cst_86 : f32 to vector<8x128xf32>
    %194 = arith.subf %192, %193 : vector<8x128xf32>
    %195 = arith.subf %194, %179 : vector<8x128xf32>
    %196 = arith.addf %175, %195 : vector<8x128xf32>
    %cst_87 = arith.constant -3.000000e+01 : f32
    %cst_88 = arith.constant 2.000000e+01 : f32
    %197 = vector.broadcast %cst_87 : f32 to vector<8x128xf32>
    %198 = arith.maximumf %197, %137 : vector<8x128xf32>
    %199 = vector.broadcast %cst_88 : f32 to vector<8x128xf32>
    %200 = arith.minimumf %199, %198 : vector<8x128xf32>
    %cst_89 = arith.constant 5.000000e-01 : f32
    %201 = vector.broadcast %cst_89 : f32 to vector<8x128xf32>
    %202 = arith.mulf %201, %200 : vector<8x128xf32>
    %203 = math.exp %202 : vector<8x128xf32>
    %204 = vector.extract_strided_slice %3 {offsets = [2, 0, 0], sizes = [1, 8, 128], strides = [1, 1, 1]} : vector<4x8x128xf32> to vector<1x8x128xf32>
    %205 = vector.shape_cast %204 : vector<1x8x128xf32> to vector<8x128xf32>
    %206 = arith.mulf %203, %205 : vector<8x128xf32>
    %207 = arith.addf %65, %206 : vector<8x128xf32>
    %c0_90 = arith.constant 0 : index
    %c2_91 = arith.constant 2 : index
    %c0_92 = arith.constant 0 : index
    %c0_93 = arith.constant 0 : index
    %208 = vector.load %arg8[%c0_90, %c2_91, %c0_92, %c0_93] : memref<1x4x8x128xf32, #tpu.memory_space<vmem>>, vector<1x1x8x128xf32>
    %209 = vector.shape_cast %208 : vector<1x1x8x128xf32> to vector<8x128xf32>
    %210 = vector.shape_cast %207 : vector<8x128xf32> to vector<1x1x8x128xf32>
    tpu.vector_store %arg8[%c0_90, %c2_91, %c0_92, %c0_93], %210 {strides = array<i32>} : memref<1x4x8x128xf32, #tpu.memory_space<vmem>>, vector<1x1x8x128xf32>,
    %211 = arith.mulf %65, %65 : vector<8x128xf32>
    %212 = arith.mulf %203, %203 : vector<8x128xf32>
    %213 = arith.addf %211, %212 : vector<8x128xf32>
    %cst_94 = arith.constant 1.000000e+00 : f32
    %214 = vector.broadcast %cst_94 : f32 to vector<8x128xf32>
    %215 = arith.subf %213, %214 : vector<8x128xf32>
    %216 = arith.subf %215, %200 : vector<8x128xf32>
    %217 = arith.addf %196, %216 : vector<8x128xf32>
    %cst_95 = arith.constant -3.000000e+01 : f32
    %cst_96 = arith.constant 2.000000e+01 : f32
    %218 = vector.broadcast %cst_95 : f32 to vector<8x128xf32>
    %219 = arith.maximumf %218, %155 : vector<8x128xf32>
    %220 = vector.broadcast %cst_96 : f32 to vector<8x128xf32>
    %221 = arith.minimumf %220, %219 : vector<8x128xf32>
    %cst_97 = arith.constant 5.000000e-01 : f32
    %222 = vector.broadcast %cst_97 : f32 to vector<8x128xf32>
    %223 = arith.mulf %222, %221 : vector<8x128xf32>
    %224 = math.exp %223 : vector<8x128xf32>
    %225 = vector.extract_strided_slice %3 {offsets = [3, 0, 0], sizes = [1, 8, 128], strides = [1, 1, 1]} : vector<4x8x128xf32> to vector<1x8x128xf32>
    %226 = vector.shape_cast %225 : vector<1x8x128xf32> to vector<8x128xf32>
    %227 = arith.mulf %224, %226 : vector<8x128xf32>
    %228 = arith.addf %83, %227 : vector<8x128xf32>
    %c0_98 = arith.constant 0 : index
    %c3_99 = arith.constant 3 : index
    %c0_100 = arith.constant 0 : index
    %c0_101 = arith.constant 0 : index
    %229 = vector.load %arg8[%c0_98, %c3_99, %c0_100, %c0_101] : memref<1x4x8x128xf32, #tpu.memory_space<vmem>>, vector<1x1x8x128xf32>
    %230 = vector.shape_cast %229 : vector<1x1x8x128xf32> to vector<8x128xf32>
    %231 = vector.shape_cast %228 : vector<8x128xf32> to vector<1x1x8x128xf32>
    tpu.vector_store %arg8[%c0_98, %c3_99, %c0_100, %c0_101], %231 {strides = array<i32>} : memref<1x4x8x128xf32, #tpu.memory_space<vmem>>, vector<1x1x8x128xf32>,
    %232 = arith.mulf %83, %83 : vector<8x128xf32>
    %233 = arith.mulf %224, %224 : vector<8x128xf32>
    %234 = arith.addf %232, %233 : vector<8x128xf32>
    %cst_102 = arith.constant 1.000000e+00 : f32
    %235 = vector.broadcast %cst_102 : f32 to vector<8x128xf32>
    %236 = arith.subf %234, %235 : vector<8x128xf32>
    %237 = arith.subf %236, %221 : vector<8x128xf32>
    %238 = arith.addf %217, %237 : vector<8x128xf32>
    %c0_103 = arith.constant 0 : index
    %c0_104 = arith.constant 0 : index
    %239 = memref.load %arg4[%c0_103, %c0_104] : memref<4x4xf32, #tpu.memory_space<smem>>
    %240 = vector.broadcast %239 : f32 to vector<8x128xf32>
    %241 = arith.mulf %166, %240 : vector<8x128xf32>
    %c0_105 = arith.constant 0 : index
    %242 = memref.load %arg5[%c0_105] : memref<4xf32, #tpu.memory_space<smem>>
    %243 = vector.broadcast %242 : f32 to vector<8x128xf32>
    %244 = arith.addf %241, %243 : vector<8x128xf32>
    %c0_106 = arith.constant 0 : index
    %c1_107 = arith.constant 1 : index
    %245 = memref.load %arg4[%c0_106, %c1_107] : memref<4x4xf32, #tpu.memory_space<smem>>
    %246 = vector.broadcast %245 : f32 to vector<8x128xf32>
    %247 = arith.mulf %186, %246 : vector<8x128xf32>
    %248 = arith.addf %244, %247 : vector<8x128xf32>
    %c0_108 = arith.constant 0 : index
    %c2_109 = arith.constant 2 : index
    %249 = memref.load %arg4[%c0_108, %c2_109] : memref<4x4xf32, #tpu.memory_space<smem>>
    %250 = vector.broadcast %249 : f32 to vector<8x128xf32>
    %251 = arith.mulf %207, %250 : vector<8x128xf32>
    %252 = arith.addf %248, %251 : vector<8x128xf32>
    %c0_110 = arith.constant 0 : index
    %c3_111 = arith.constant 3 : index
    %253 = memref.load %arg4[%c0_110, %c3_111] : memref<4x4xf32, #tpu.memory_space<smem>>
    %254 = vector.broadcast %253 : f32 to vector<8x128xf32>
    %255 = arith.mulf %228, %254 : vector<8x128xf32>
    %256 = arith.addf %252, %255 : vector<8x128xf32>
    %c0_112 = arith.constant 0 : index
    %c0_113 = arith.constant 0 : index
    %c0_114 = arith.constant 0 : index
    %c0_115 = arith.constant 0 : index
    %257 = vector.load %arg9[%c0_112, %c0_113, %c0_114, %c0_115] : memref<1x4x8x128xf32, #tpu.memory_space<vmem>>, vector<1x1x8x128xf32>
    %258 = vector.shape_cast %257 : vector<1x1x8x128xf32> to vector<8x128xf32>
    %259 = vector.shape_cast %256 : vector<8x128xf32> to vector<1x1x8x128xf32>
    tpu.vector_store %arg9[%c0_112, %c0_113, %c0_114, %c0_115], %259 {strides = array<i32>} : memref<1x4x8x128xf32, #tpu.memory_space<vmem>>, vector<1x1x8x128xf32>,
    %260 = arith.subf %256, %5 : vector<8x128xf32>
    %261 = arith.mulf %260, %260 : vector<8x128xf32>
    %c1_116 = arith.constant 1 : index
    %c0_117 = arith.constant 0 : index
    %262 = memref.load %arg4[%c1_116, %c0_117] : memref<4x4xf32, #tpu.memory_space<smem>>
    %263 = vector.broadcast %262 : f32 to vector<8x128xf32>
    %264 = arith.mulf %166, %263 : vector<8x128xf32>
    %c1_118 = arith.constant 1 : index
    %265 = memref.load %arg5[%c1_118] : memref<4xf32, #tpu.memory_space<smem>>
    %266 = vector.broadcast %265 : f32 to vector<8x128xf32>
    %267 = arith.addf %264, %266 : vector<8x128xf32>
    %c1_119 = arith.constant 1 : index
    %c1_120 = arith.constant 1 : index
    %268 = memref.load %arg4[%c1_119, %c1_120] : memref<4x4xf32, #tpu.memory_space<smem>>
    %269 = vector.broadcast %268 : f32 to vector<8x128xf32>
    %270 = arith.mulf %186, %269 : vector<8x128xf32>
    %271 = arith.addf %267, %270 : vector<8x128xf32>
    %c1_121 = arith.constant 1 : index
    %c2_122 = arith.constant 2 : index
    %272 = memref.load %arg4[%c1_121, %c2_122] : memref<4x4xf32, #tpu.memory_space<smem>>
    %273 = vector.broadcast %272 : f32 to vector<8x128xf32>
    %274 = arith.mulf %207, %273 : vector<8x128xf32>
    %275 = arith.addf %271, %274 : vector<8x128xf32>
    %c1_123 = arith.constant 1 : index
    %c3_124 = arith.constant 3 : index
    %276 = memref.load %arg4[%c1_123, %c3_124] : memref<4x4xf32, #tpu.memory_space<smem>>
    %277 = vector.broadcast %276 : f32 to vector<8x128xf32>
    %278 = arith.mulf %228, %277 : vector<8x128xf32>
    %279 = arith.addf %275, %278 : vector<8x128xf32>
    %c0_125 = arith.constant 0 : index
    %c1_126 = arith.constant 1 : index
    %c0_127 = arith.constant 0 : index
    %c0_128 = arith.constant 0 : index
    %280 = vector.load %arg9[%c0_125, %c1_126, %c0_127, %c0_128] : memref<1x4x8x128xf32, #tpu.memory_space<vmem>>, vector<1x1x8x128xf32>
    %281 = vector.shape_cast %280 : vector<1x1x8x128xf32> to vector<8x128xf32>
    %282 = vector.shape_cast %279 : vector<8x128xf32> to vector<1x1x8x128xf32>
    tpu.vector_store %arg9[%c0_125, %c1_126, %c0_127, %c0_128], %282 {strides = array<i32>} : memref<1x4x8x128xf32, #tpu.memory_space<vmem>>, vector<1x1x8x128xf32>,
    %283 = arith.subf %279, %7 : vector<8x128xf32>
    %284 = arith.mulf %283, %283 : vector<8x128xf32>
    %285 = arith.addf %261, %284 : vector<8x128xf32>
    %c2_129 = arith.constant 2 : index
    %c0_130 = arith.constant 0 : index
    %286 = memref.load %arg4[%c2_129, %c0_130] : memref<4x4xf32, #tpu.memory_space<smem>>
    %287 = vector.broadcast %286 : f32 to vector<8x128xf32>
    %288 = arith.mulf %166, %287 : vector<8x128xf32>
    %c2_131 = arith.constant 2 : index
    %289 = memref.load %arg5[%c2_131] : memref<4xf32, #tpu.memory_space<smem>>
    %290 = vector.broadcast %289 : f32 to vector<8x128xf32>
    %291 = arith.addf %288, %290 : vector<8x128xf32>
    %c2_132 = arith.constant 2 : index
    %c1_133 = arith.constant 1 : index
    %292 = memref.load %arg4[%c2_132, %c1_133] : memref<4x4xf32, #tpu.memory_space<smem>>
    %293 = vector.broadcast %292 : f32 to vector<8x128xf32>
    %294 = arith.mulf %186, %293 : vector<8x128xf32>
    %295 = arith.addf %291, %294 : vector<8x128xf32>
    %c2_134 = arith.constant 2 : index
    %c2_135 = arith.constant 2 : index
    %296 = memref.load %arg4[%c2_134, %c2_135] : memref<4x4xf32, #tpu.memory_space<smem>>
    %297 = vector.broadcast %296 : f32 to vector<8x128xf32>
    %298 = arith.mulf %207, %297 : vector<8x128xf32>
    %299 = arith.addf %295, %298 : vector<8x128xf32>
    %c2_136 = arith.constant 2 : index
    %c3_137 = arith.constant 3 : index
    %300 = memref.load %arg4[%c2_136, %c3_137] : memref<4x4xf32, #tpu.memory_space<smem>>
    %301 = vector.broadcast %300 : f32 to vector<8x128xf32>
    %302 = arith.mulf %228, %301 : vector<8x128xf32>
    %303 = arith.addf %299, %302 : vector<8x128xf32>
    %c0_138 = arith.constant 0 : index
    %c2_139 = arith.constant 2 : index
    %c0_140 = arith.constant 0 : index
    %c0_141 = arith.constant 0 : index
    %304 = vector.load %arg9[%c0_138, %c2_139, %c0_140, %c0_141] : memref<1x4x8x128xf32, #tpu.memory_space<vmem>>, vector<1x1x8x128xf32>
    %305 = vector.shape_cast %304 : vector<1x1x8x128xf32> to vector<8x128xf32>
    %306 = vector.shape_cast %303 : vector<8x128xf32> to vector<1x1x8x128xf32>
    tpu.vector_store %arg9[%c0_138, %c2_139, %c0_140, %c0_141], %306 {strides = array<i32>} : memref<1x4x8x128xf32, #tpu.memory_space<vmem>>, vector<1x1x8x128xf32>,
    %307 = arith.subf %303, %9 : vector<8x128xf32>
    %308 = arith.mulf %307, %307 : vector<8x128xf32>
    %309 = arith.addf %285, %308 : vector<8x128xf32>
    %c3_142 = arith.constant 3 : index
    %c0_143 = arith.constant 0 : index
    %310 = memref.load %arg4[%c3_142, %c0_143] : memref<4x4xf32, #tpu.memory_space<smem>>
    %311 = vector.broadcast %310 : f32 to vector<8x128xf32>
    %312 = arith.mulf %166, %311 : vector<8x128xf32>
    %c3_144 = arith.constant 3 : index
    %313 = memref.load %arg5[%c3_144] : memref<4xf32, #tpu.memory_space<smem>>
    %314 = vector.broadcast %313 : f32 to vector<8x128xf32>
    %315 = arith.addf %312, %314 : vector<8x128xf32>
    %c3_145 = arith.constant 3 : index
    %c1_146 = arith.constant 1 : index
    %316 = memref.load %arg4[%c3_145, %c1_146] : memref<4x4xf32, #tpu.memory_space<smem>>
    %317 = vector.broadcast %316 : f32 to vector<8x128xf32>
    %318 = arith.mulf %186, %317 : vector<8x128xf32>
    %319 = arith.addf %315, %318 : vector<8x128xf32>
    %c3_147 = arith.constant 3 : index
    %c2_148 = arith.constant 2 : index
    %320 = memref.load %arg4[%c3_147, %c2_148] : memref<4x4xf32, #tpu.memory_space<smem>>
    %321 = vector.broadcast %320 : f32 to vector<8x128xf32>
    %322 = arith.mulf %207, %321 : vector<8x128xf32>
    %323 = arith.addf %319, %322 : vector<8x128xf32>
    %c3_149 = arith.constant 3 : index
    %c3_150 = arith.constant 3 : index
    %324 = memref.load %arg4[%c3_149, %c3_150] : memref<4x4xf32, #tpu.memory_space<smem>>
    %325 = vector.broadcast %324 : f32 to vector<8x128xf32>
    %326 = arith.mulf %228, %325 : vector<8x128xf32>
    %327 = arith.addf %323, %326 : vector<8x128xf32>
    %c0_151 = arith.constant 0 : index
    %c3_152 = arith.constant 3 : index
    %c0_153 = arith.constant 0 : index
    %c0_154 = arith.constant 0 : index
    %328 = vector.load %arg9[%c0_151, %c3_152, %c0_153, %c0_154] : memref<1x4x8x128xf32, #tpu.memory_space<vmem>>, vector<1x1x8x128xf32>
    %329 = vector.shape_cast %328 : vector<1x1x8x128xf32> to vector<8x128xf32>
    %330 = vector.shape_cast %327 : vector<8x128xf32> to vector<1x1x8x128xf32>
    tpu.vector_store %arg9[%c0_151, %c3_152, %c0_153, %c0_154], %330 {strides = array<i32>} : memref<1x4x8x128xf32, #tpu.memory_space<vmem>>, vector<1x1x8x128xf32>,
    %331 = arith.subf %327, %11 : vector<8x128xf32>
    %332 = arith.mulf %331, %331 : vector<8x128xf32>
    %333 = arith.addf %309, %332 : vector<8x128xf32>
    %cst_155 = arith.constant 5.000000e-01 : f32
    %334 = vector.broadcast %cst_155 : f32 to vector<8x128xf32>
    %335 = arith.mulf %334, %238 : vector<8x128xf32>
    %336 = arith.addf %333, %335 : vector<8x128xf32>
    %337 = tpu.iota {dimensions = array<i32: 0>} : vector<8x128xi32>
    %338 = tpu.iota {dimensions = array<i32: 1>} : vector<8x128xi32>
    %c8_i32 = arith.constant 8 : i32
    %339 = arith.muli %arg1, %c8_i32 : i32
    %340 = vector.broadcast %339 : i32 to vector<8x128xi32>
    %341 = arith.addi %340, %337 : vector<8x128xi32>
    %c128_i32 = arith.constant 128 : i32
    %342 = vector.broadcast %c128_i32 : i32 to vector<8x128xi32>
    %343 = arith.muli %341, %342 : vector<8x128xi32>
    %344 = arith.addi %343, %338 : vector<8x128xi32>
    %c256_i32 = arith.constant 256 : i32
    %345 = vector.broadcast %c256_i32 : i32 to vector<8x128xi32>
    %346 = arith.cmpi slt, %344, %345 : vector<8x128xi32>
    %cst_156 = arith.constant 0.000000e+00 : f32
    %347 = vector.broadcast %cst_156 : f32 to vector<8x128xf32>
    %348 = arith.select %346, %336, %347 : vector<8x128xi1>, vector<8x128xf32>
    %349 = vector.shape_cast %348 : vector<8x128xf32> to vector<1x8x128xf32>
    %cst_157 = arith.constant dense<0.000000e+00> : vector<1xf32>
    %350 = vector.multi_reduction <add>, %349, %cst_157 [1, 2] : vector<1x8x128xf32> to vector<1xf32>
    %351 = vector.shape_cast %350 : vector<1xf32> to vector<1x1x1xf32>
    %352 = vector.extract %351[0, 0, 0] : f32 from vector<1x1x1xf32>
    %353 = vector.broadcast %352 : f32 to vector<1x8x128xf32>
    %c0_158 = arith.constant 0 : index
    %c0_159 = arith.constant 0 : index
    %c0_160 = arith.constant 0 : index
    %c0_161 = arith.constant 0 : index
    %354 = vector.load %arg10[%c0_158, %c0_159, %c0_160, %c0_161] : memref<1x1x8x128xf32, #tpu.memory_space<vmem>>, vector<1x1x8x128xf32>
    %355 = vector.shape_cast %354 : vector<1x1x8x128xf32> to vector<1x8x128xf32>
    %356 = vector.shape_cast %353 : vector<1x8x128xf32> to vector<1x1x8x128xf32>
    tpu.vector_store %arg10[%c0_158, %c0_159, %c0_160, %c0_161], %356 {strides = array<i32>} : memref<1x1x8x128xf32, #tpu.memory_space<vmem>>, vector<1x1x8x128xf32>,
    return
  }
  func.func @transform_0(%arg0: i32, %arg1: i32) -> (i32, i32) {
    %c0_i32 = arith.constant 0 : i32
    %c0_i32_0 = arith.constant 0 : i32
    %c0_i32_1 = arith.constant 0 : i32
    return %c0_i32, %c0_i32_0 : i32, i32
  }
  func.func @transform_1(%arg0: i32, %arg1: i32) -> i32 {
    %c0_i32 = arith.constant 0 : i32
    %c0_i32_0 = arith.constant 0 : i32
    return %c0_i32 : i32
  }
  func.func @transform_2(%arg0: i32, %arg1: i32) -> (i32, i32) {
    %c0_i32 = arith.constant 0 : i32
    %c0_i32_0 = arith.constant 0 : i32
    %c0_i32_1 = arith.constant 0 : i32
    return %c0_i32, %c0_i32_0 : i32, i32
  }
  func.func @transform_3(%arg0: i32, %arg1: i32) -> i32 {
    %c0_i32 = arith.constant 0 : i32
    %c0_i32_0 = arith.constant 0 : i32
    return %c0_i32 : i32
  }
  func.func @transform_4(%arg0: i32, %arg1: i32) -> (i32, i32, i32, i32) {
    %c0_i32 = arith.constant 0 : i32
    %c0_i32_0 = arith.constant 0 : i32
    %c0_i32_1 = arith.constant 0 : i32
    return %arg0, %c0_i32, %arg1, %c0_i32_0 : i32, i32, i32, i32
  }
  func.func @transform_5(%arg0: i32, %arg1: i32) -> (i32, i32, i32, i32) {
    %c0_i32 = arith.constant 0 : i32
    %c0_i32_0 = arith.constant 0 : i32
    %c0_i32_1 = arith.constant 0 : i32
    return %arg0, %c0_i32, %arg1, %c0_i32_0 : i32, i32, i32, i32
  }
  func.func @transform_6(%arg0: i32, %arg1: i32) -> (i32, i32, i32, i32) {
    %c0_i32 = arith.constant 0 : i32
    %c0_i32_0 = arith.constant 0 : i32
    %c0_i32_1 = arith.constant 0 : i32
    return %arg0, %c0_i32, %arg1, %c0_i32_0 : i32, i32, i32, i32
  }
  func.func @transform_7(%arg0: i32, %arg1: i32) -> (i32, i32, i32, i32) {
    %c0_i32 = arith.constant 0 : i32
    %c0_i32_0 = arith.constant 0 : i32
    %c0_i32_1 = arith.constant 0 : i32
    return %arg0, %c0_i32, %arg1, %c0_i32_0 : i32, i32, i32, i32
  }
  func.func @transform_8(%arg0: i32, %arg1: i32) -> (i32, i32, i32, i32) {
    %c0_i32 = arith.constant 0 : i32
    %c0_i32_0 = arith.constant 0 : i32
    %c0_i32_1 = arith.constant 0 : i32
    return %arg0, %arg1, %c0_i32, %c0_i32_0 : i32, i32, i32, i32
  }
}

</mosaic_0001>

<bundles_post_ra>
// kernel: base_vae_forward.1
= control target key start
LH: loop header
LB: loop body
LE: loop exit
PB: predicated region body
PF: predicated region fallthrough
CT: control target
= control target key end

     0   :  { %s1744_s0 = inlined_call_operand.vmem [shape: f32[8,4], index: 0, kind: input, shape index: {}]   ;;  %s1745_s1 = inlined_call_operand.vmem [shape: f32[8], index: 1, kind: input, shape index: {}]   ;;  %s1746_s2 = inlined_call_operand.vmem [shape: f32[4,4], index: 2, kind: input, shape index: {}]   ;;  %s1747_s3 = inlined_call_operand.vmem [shape: f32[4], index: 3, kind: input, shape index: {}]   ;;  %s1748_s4 = inlined_call_operand.vmem [shape: f32[2,4,8,128], index: 4, kind: input, shape index: {}]   ;;  %s1749_s5 = inlined_call_operand.vmem [shape: f32[2,4,8,128], index: 5, kind: input, shape index: {}]   ;;  %s1750_s6 = inlined_call_operand.vmem [shape: f32[2,4,8,128], index: 6, kind: output, shape index: {0}]   ;;  %s1751_s7 = inlined_call_operand.vmem [shape: f32[2,4,8,128], index: 7, kind: output, shape index: {1}]   ;;  %s1752_s8 = inlined_call_operand.vmem [shape: f32[2,1,8,128], index: 8, kind: output, shape index: {2}]  }
   0x1   :  { %1757 = sst [smem:[#allocation14_spill]] %s1744_s0 }
   0x2   :  { %1758 = sst [smem:[#allocation15_spill]] %s1745_s1 }
   0x3   :  { %1759 = sst [smem:[#allocation16_spill]] %s1746_s2 }
   0x4   :  { %1760 = sst [smem:[#allocation17_spill]] %s1747_s3 }
   0x5   :  { %1761 = sst [smem:[#allocation18_spill]] %s1748_s4 }
   0x6   :  { %14 = vsyncpa [#allocation3], 0 }
   0x7   :  { %15 = vsyncpa [#allocation5], 0 }
   0x8   :  { %16 = vsyncpa [#allocation8], 0  ;;  %s1328_s27 = smov 0   ;;  %s1330_s28 = smov 0  }
   0x9   :  { %s1332_s29 = smov 0  }
   0xa LB: > { %1762 = sst [smem:[#allocation12_spill]] %s1273_s28  ;;  %s1763_s1 = sld [smem:[#allocation15_spill]]  ;;  %s1277_s29 = sphi %s1332_s29, %s22_s29   ;;  %s1273_s28 = sphi %s1330_s28, %s1776_s28   ;;  %s1269_s27 = sphi %s1328_s27, %s1775_s27  }
   0xb   : > { %s1014_s11 = sadd.s32 4294967295, %s1277_s29   ;;  %p1016_p0 = scmp.ge.s32.totalorder %s1277_s29, 1 }
   0xc   : > { %p263_p1 = scmp.lt.s32.totalorder %s1277_s29, 3  ;;  %p1349_p2 = scmp.eq.s32.totalorder %s1014_s11, 0 }
   0xd   : > { %s34_s14 = sadd.s32 1, %s1273_s28  ;;  %s1766_s0 = sld [smem:[#allocation14_spill]] }
   0xe   : > { %s1764_s12 = scalar_select %p1349_p2, 1, 0 }
   0xf   : > { %p1353_p3 = pnand %p1016_p0, %p263_p1  ;;  %p1369_p6 = scmp.ge.s32.totalorder %s34_s14, 2 }
  0x10   : > { %s287_s10 = sshll.u32 %s1763_s1, 4  ;;  %s1769_s2 = sld [smem:[#allocation16_spill]]  ;;  %s288_s10 = int_to_ptr.vmem [resolvable:$true] %s287_s10 }
  0x11   : > { %s1765_s13 = scalar_select %p1353_p3, 1, 0 }
  0x12   : > { %p1126_p4 = pneg %p1353_p3  ;;  %s1183_s23 = scalar_lea.vmem %s288_s10, 16 }
  0x13   : > { %s276_s17 = sshll.u32 %s1766_s0, 4  ;;  %p1184_p7 = scmp.ne.s32.totalorder %s288_s10, %s1183_s23  ;;  %s277_s17 = int_to_ptr.vmem [resolvable:$true] %s276_s17 }
  0x14   : > { %p1365_p5 = pnand %p1349_p2, %p1126_p4  ;;  %p1191_p11 = scmp.lt.s32.totalorder %s288_s10, %s288_s10 }
  0x15   : > { %p1192_p12 = scmp.lt.s32.totalorder %s1183_s23, %s1183_s23 }
  0x16   : > { %s298_s22 = sshll.u32 %s1769_s2, 4  ;;  %p1185_p8 = pneg %p1365_p5  ;;  %s299_s22 = int_to_ptr.vmem [resolvable:$true] %s298_s22 }
  0x17   : > { %p1193_p13 = por %p1192_p12, %p1191_p11 }
  0x18   : > { %p1186_p9 = pnand %p1185_p8, %p1184_p7 }
  0x1a   : > { %p1187_p10 = pneg %p1186_p9 }
  0x1c   : > { %p1194_p0 = pnand %p1193_p13, %p1187_p10 }
  0x1e   : > { %1197 = shalt.err (!%p1194_p0)
}
  0x1f   : > { %s1279_s24 = smov [#allocation4]   ;;  %s1778_s14 = smov (%p1369_p6, %s34_s14), 0 }
  0x20   : > { %1132 = dma.vmem_to_smem (!%p1365_p5), %s288_s10, 16, %s1279_s24, [#allocation5]  }
  0x21   : > { %1770 = sst [smem:[#allocation13_spill]] %s1778_s14  ;;  %s1198_s25 = scalar_lea.vmem %s277_s17, 128 }
  0x22   : > { %p1199_p1 = scmp.ne.s32.totalorder %s277_s17, %s1198_s25  ;;  %p1206_p9 = scmp.lt.s32.totalorder %s277_s17, %s277_s17 }
  0x23   : > { %p1207_p2 = scmp.lt.s32.totalorder %s1198_s25, %s1198_s25 }
  0x24   : > { %p1201_p4 = pnand %p1199_p1, %p1185_p8 }
  0x25   : > { %p1208_p11 = por %p1207_p2, %p1206_p9 }
  0x26   : > { %p1202_p7 = pneg %p1201_p4 }
  0x28   : > { %p1209_p10 = pnand %p1208_p11, %p1202_p7 }
  0x2a   : > { %1212 = shalt.err (!%p1209_p10)
}
  0x2b   : > { %s1280_s26 = smov [#allocation2]   ;;  %s1213_s30 = scalar_lea.vmem %s299_s22, 64 }
  0x2c   : > { %1129 = dma.vmem_to_smem (!%p1365_p5), %s277_s17, 128, %s1280_s26, [#allocation3]  }
  0x2d   : > { %p1214_p6 = scmp.ne.s32.totalorder %s299_s22, %s1213_s30  ;;  %p1221_p0 = scmp.lt.s32.totalorder %s299_s22, %s299_s22 }
  0x2e   : > { %p1222_p1 = scmp.lt.s32.totalorder %s1213_s30, %s1213_s30 }
  0x2f   : > { %p1216_p12 = pnand %p1214_p6, %p1185_p8 }
  0x30   : > { %p1223_p4 = por %p1222_p1, %p1221_p0 }
  0x31   : > { %p1217_p13 = pneg %p1216_p12 }
  0x33   : > { %p1224_p3 = pnand %p1223_p4, %p1217_p13 }
  0x35   : > { %1227 = shalt.err (!%p1224_p3)
}
  0x36   : > { %s1281_s9 = smov [#allocation6]   ;;  %s1771_s3 = sld [smem:[#allocation17_spill]] }
  0x37   : > { %1135 = dma.vmem_to_smem (!%p1365_p5), %s299_s22, 64, %s1281_s9, [#allocation5]  }
  0x3c   : > { %s309_s15 = sshll.u32 %s1771_s3, 4  ;;  %s310_s15 = int_to_ptr.vmem [resolvable:$true] %s309_s15 }
  0x3d   : > { %s1228_s16 = scalar_lea.vmem %s310_s15, 16  ;;  %p1236_p11 = scmp.lt.s32.totalorder %s310_s15, %s310_s15 }
  0x3e   : > { %p1229_p2 = scmp.ne.s32.totalorder %s310_s15, %s1228_s16  ;;  %p1237_p10 = scmp.lt.s32.totalorder %s1228_s16, %s1228_s16 }
  0x40   : > { %p1231_p7 = pnand %p1229_p2, %p1185_p8  ;;  %p1238_p6 = por %p1237_p10, %p1236_p11 }
  0x42   : > { %p1232_p9 = pneg %p1231_p7 }
  0x44   : > { %p1239_p3 = pnand %p1238_p6, %p1232_p9 }
  0x46   : > { %1242 = shalt.err (!%p1239_p3)
}
  0x47   : > { %s1282_s17 = smov [#allocation7]   ;;  %p1772_p12 = scmp.ne.s32.totalorder %s1765_s13, 0 }
  0x48   : > { %1138 = dma.vmem_to_smem (!%p1365_p5), %s310_s15, 16, %s1282_s17, [#allocation8]  }
  0x49   : > { %344 = sbr.rel (%p1772_p12) target bundleno = 371 (0x173), region = 44  ;;  %p1773_p13 = scmp.ne.s32.totalorder (!%p1772_p12), %s1764_s12, 0 }
  0x50   : > { %1256 = dma.done.wait (%p1773_p13), [#allocation3], 128  }
  0x51   : > { %1258 = vsyncadd (%p1773_p13), [#allocation3], 4294967168 }
  0x52   : > { %1260 = dma.done.wait (%p1773_p13), [#allocation5], 80  }
  0x53   : > { %1262 = vsyncadd (%p1773_p13), [#allocation5], 4294967216 }
  0x54   : > { %1264 = dma.done.wait (%p1773_p13), [#allocation8], 16  }
  0x55   : > { %1266 = vsyncadd (%p1773_p13), [#allocation8], 4294967280 }
  0x56   : > { %362 = sfence }
  0x57   : > { %p420_p5 = scmp.lt.s32.totalorder %s1269_s27, 1  ;;  %s467_s13 = sld [smem:[#allocation2]] }
  0x58   : > { %s470_s18 = sld [smem:[#allocation4]]  ;;  %s1036_s20 = sld [smem:[#allocation2 + $0x1]] }
  0x59   : > { %s1780_s27 = smov (!%p420_p5, %s1269_s27), 1  ;;  %s1426_s21 = sld [smem:[#allocation2 + $0x80]] }
  0x5a   : > { %s1424_s19 = sshll.u32 %s1780_s27, 5  ;;  %s1774_s4 = sld [smem:[#allocation18_spill]] }
  0x5b   : > { %s1434_s24 = sld [smem:[#allocation2 + $0x2]]  ;;  %s1436_s25 = sld [smem:[#allocation2 + $0x3]] }
  0x5c   : > { %s1438_s26 = sld [smem:[#allocation2 + $0x81]]  ;;  %s1440_s30 = sld [smem:[#allocation2 + $0x100]] }
  0x5d   : > { %v468_v0 = vstv %s467_s13  ;;  %s1445_s9 = sld [smem:[#allocation4 + $0x1]]  ;;  %s1447_s10 = sld [smem:[#allocation2 + $0x82]] }
  0x5e   : > { %s1450_s11 = sld [smem:[#allocation2 + $0x83]]  ;;  %s1452_s15 = sld [smem:[#allocation2 + $0x101]]  ;;  %v471_v3 = vstv %s470_s18  ;;  %v474_v4 = vstv %s1036_s20 }
  0x5f   : > { %s1454_s16 = sld [smem:[#allocation4 + $0x2]]  ;;  %s1458_s13 = sld [smem:[#allocation2 + $0x180]]  ;;  %v486_v6 = vstv %s1426_s21 }
  0x60   : > { %s1432_s12 = scalar_lea.vmem %s1774_s4, %s1424_s19  ;;  %s1456_s17 = sld [smem:[#allocation2 + $0x102]] }
  0x61   : > { %v1443_v1 = vld [vmem:[%s1432_s12] sm:$0xff]  ;;  %s1460_s22 = sld [smem:[#allocation4 + $0x3]]  ;;  %v1463_v5 = vld [vmem:[%s1432_s12 + $0x8] sm:$0xff]  ;;  %s1466_s23 = sld [smem:[#allocation2 + $0x200]]  ;;  %v478_v9 = vstv %s1434_s24  ;;  %v1488_v13 = vld [vmem:[%s1432_s12 + $0x10] sm:$0xff] }
  0x62   : > { %v469_v2 = vmul.f32 %v468_v0, %v1443_v1  ;;  %s1468_s0 = sld [smem:[#allocation4 + $0x4]]  ;;  %v475_v8 = vmul.f32 %v474_v4, %v1463_v5  ;;  %s1471_s18 = sld [smem:[#allocation2 + $0x201]]  ;;  %v504_v10 = vstv %s1440_s30  ;;  %v487_v11 = vmul.f32 %v486_v6, %v1443_v1  ;;  %v1527_v28 = vld [vmem:[%s1432_s12 + $0x18] sm:$0xff] }
  0x63   : > { %s1473_s20 = sld [smem:[#allocation2 + $0x202]]  ;;  %s1477_s1 = sld [smem:[#allocation2 + $0x203]]  ;;  %v492_v12 = vstv %s1438_s26  ;;  %v482_v14 = vstv %s1436_s25  ;;  %v489_v15 = vstv %s1445_s9  ;;  %v1499_v17 = vmul.f32 %v478_v9, %v1488_v13 }
  0x64   : > { %v472_v7 = vadd.f32 %v471_v3, %v469_v2  ;;  %s1479_s2 = sld [smem:[#allocation2 + $0x280]]  ;;  %s1483_s21 = sld [smem:[#allocation4 + $0x5]]  ;;  %v505_v18 = vmul.f32 %v504_v10, %v1443_v1  ;;  %v510_v19 = vstv %s1452_s15  ;;  %v1508_v20 = vmul.f32 %v492_v12, %v1463_v5 }
  0x65   : > { %s1485_s3 = sld [smem:[#allocation2 + $0x281]]  ;;  %s1494_s30 = sld [smem:[#allocation2 + $0x282]]  ;;  %v496_v21 = vstv %s1447_s10  ;;  %v500_v22 = vstv %s1450_s11  ;;  %v507_v23 = vstv %s1454_s16  ;;  %v1517_v24 = vadd.f32 %v489_v15, %v487_v11 }
  0x66   : > { %s1492_s24 = sld [smem:[#allocation2 + $0x181]]  ;;  %v1496_v16 = vadd.f32 %v475_v8, %v472_v7  ;;  %s1503_s26 = sld [smem:[#allocation2 + $0x283]]  ;;  %v514_v25 = vstv %s1456_s17  ;;  %v522_v26 = vstv %s1458_s13  ;;  %v1530_v29 = vmul.f32 %v510_v19, %v1463_v5 }
  0x67   : > { %s1505_s4 = sld [smem:[#allocation2 + $0x300]]  ;;  %s1513_s9 = sld [smem:[#allocation4 + $0x6]]  ;;  %v540_v27 = vstv %s1466_s23  ;;  %v1535_v33 = vadd.f32 %v507_v23, %v505_v18  ;;  %v523_v37 = vmul.f32 %v522_v26, %v1443_v1  ;;  %v525_v38 = vstv %s1460_s22 }
  0x68   : > { %s1515_s14 = sld [smem:[#allocation2 + $0x301]]  ;;  %s1522_s15 = sld [smem:[#allocation2 + $0x302]]  ;;  %v541_v30 = vmul.f32 %v540_v27, %v1443_v1  ;;  %v543_v31 = vstv %s1468_s0  ;;  %v546_v32 = vstv %s1471_s18 }
  0x69   : > { %s1524_s28 = sld [smem:[#allocation2 + $0x303]]  ;;  %v547_v34 = vmul.f32 %v546_v32, %v1463_v5  ;;  %v550_v35 = vstv %s1473_s20  ;;  %v554_v36 = vstv %s1477_s1  ;;  %s1540_s16 = sld [smem:[#allocation2 + $0x380]] }
  0x6a   : > { %s1542_s12 = sld [smem:[#allocation4 + $0x7]]  ;;  %v544_v39 = vadd.f32 %v543_v31, %v541_v30  ;;  %v551_v40 = vmul.f32 %v550_v35, %v1488_v13  ;;  %s1547_s0 = sld [smem:[#allocation2 + $0x381]]  ;;  %v555_v41 = vmul.f32 %v554_v36, %v1527_v28  ;;  %v558_v42 = vstv %s1479_s2 }
  0x6b   : > { %v561_v43 = vstv %s1483_s21  ;;  %v564_v44 = vstv %s1485_s3  ;;  %s1553_s1 = sld [smem:[#allocation2 + $0x382]]  ;;  %s1555_s13 = sld [smem:[#allocation2 + $0x383]]  ;;  %v559_v46 = vmul.f32 %v558_v42, %v1443_v1  ;;  %v568_v48 = vstv %s1494_s30 }
  0x6c   : > { %v548_v45 = vadd.f32 %v547_v34, %v544_v39  ;;  %v565_v47 = vmul.f32 %v564_v44, %v1463_v5  ;;  %v528_v49 = vstv %s1492_s24  ;;  %s1561_s22 = sld [smem:[#allocation2 + $0x182]]  ;;  %v569_v50 = vmul.f32 %v568_v48, %v1488_v13  ;;  %s1572_s2 = sld [smem:[#allocation2 + $0x103]] }
  0x6d   : > { %v572_v51 = vstv %s1503_s26  ;;  %v576_v52 = vstv %s1505_s4  ;;  %v562_v54 = vadd.f32 %v561_v43, %v559_v46  ;;  %v579_v57 = vstv %s1513_s9  ;;  %s1579_s3 = sld [smem:[#allocation2 + $0x183]]  ;;  %s1601_s4 = sld [smem:[#allocation6]] }
  0x6e   : > { %v552_v53 = vadd.f32 %v551_v40, %v548_v45  ;;  %v573_v55 = vmul.f32 %v572_v51, %v1527_v28  ;;  %v577_v56 = vmul.f32 %v576_v52, %v1443_v1  ;;  %v582_v58 = vstv %s1515_s14  ;;  %s1608_s14 = sld [smem:[#allocation6 + $0x1]]  ;;  %s1613_s10 = sld [smem:[#allocation6 + $0x2]] }
  0x6f   : > { %v586_v59 = vstv %s1522_s15  ;;  %v590_v60 = vstv %s1524_s28  ;;  %v566_v62 = vadd.f32 %v565_v47, %v562_v54  ;;  %v583_v0 = vmul.f32 %v582_v58, %v1463_v5  ;;  %s1606_s28 = sld [smem:[#allocation7]]  ;;  %s1615_s17 = sld [smem:[#allocation6 + $0x3]] }
  0x70   : > { %v556_v61 = vadd.f32 %v555_v41, %v552_v53  ;;  %v580_v63 = vadd.f32 %v579_v57, %v577_v56  ;;  %v587_v2 = vmul.f32 %v586_v59, %v1488_v13  ;;  %v591_v3 = vmul.f32 %v590_v60, %v1527_v28  ;;  %s1621_s23 = sld [smem:[#allocation6 + $0x80]]  ;;  %s1623_s18 = sld [smem:[#allocation7 + $0x1]] }
  0x71   : > { %v594_v4 = vstv %s1540_s16  ;;  %v597_v6 = vstv %s1542_s12  ;;  %v570_v7 = vadd.f32 %v569_v50, %v566_v62  ;;  %v600_v10 = vstv %s1547_s0  ;;  %s1633_s20 = sld [smem:[#allocation6 + $0x81]]  ;;  %s1635_s21 = sld [smem:[#allocation6 + $0x82]] }
  0x72   : > { %v584_v8 = vadd.f32 %v583_v0, %v580_v63  ;;  %v595_v9 = vmul.f32 %v594_v4, %v1443_v1  ;;  %v601_v11 = vmul.f32 %v600_v10, %v1463_v5  ;;  %v604_v12 = vstv %s1553_s1  ;;  %s1638_s24 = sld [smem:[#allocation6 + $0x83]]  ;;  %s1642_s25 = sld [smem:[#allocation6 + $0x100]] }
  0x73   : > { %v608_v15 = vstv %s1555_s13  ;;  %v611_v18 = vmax.f32 %v556_v61, -30.0  ;;  %v574_v19 = vadd.f32 %v573_v55, %v570_v7  ;;  %v605_v27 = vmul.f32 %v604_v12, %v1488_v13  ;;  %s1644_s11 = sld [smem:[#allocation7 + $0x2]]  ;;  %s1650_s9 = scalar_lea.vmem %s1749_s5, %s1424_s19 }
  0x74   : > { %v588_v23 = vadd.f32 %v587_v2, %v584_v8  ;;  %v598_v26 = vadd.f32 %v597_v6, %v595_v9  ;;  %v526_v30 = vadd.f32 %v525_v38, %v523_v37  ;;  %v529_v31 = vmul.f32 %v528_v49, %v1463_v5  ;;  %s1654_s15 = sld [smem:[#allocation6 + $0x101]]  ;;  %s1656_s16 = sld [smem:[#allocation6 + $0x102]]  ;;  %v463_v4 = vld [vmem:[%s1650_s9] sm:$0xff] }
  0x75   : > { %v532_v32 = vstv %s1561_s22  ;;  %v1589_v34 = vmin.f32 %v611_v18, 20.0  ;;  %v609_v39 = vmul.f32 %v608_v15, %v1527_v28  ;;  %v624_v40 = vmax.f32 %v574_v19, -30.0  ;;  %s1658_s12 = sld [smem:[#allocation6 + $0x103]]  ;;  %s1661_s0 = sld [smem:[#allocation6 + $0x180]] }
  0x76   : > { %v592_v35 = vadd.f32 %v591_v3, %v588_v23  ;;  %v602_v36 = vadd.f32 %v601_v11, %v598_v26  ;;  %v494_v41 = vadd.f32 %v1508_v20, %v1517_v24  ;;  %v497_v42 = vmul.f32 %v496_v21, %v1488_v13  ;;  %s1663_s1 = sld [smem:[#allocation7 + $0x3]]  ;;  %s1667_s13 = sld [smem:[#allocation6 + $0x181]] }
  0x77   : > { %v515_v37 = vmul.f32 %v514_v25, %v1488_v13  ;;  %v613_v38 = vmul.f32 0.5, %v1589_v34  ;;  %v518_v43 = vstv %s1572_s2  ;;  %v1604_v45 = vmin.f32 %v624_v40, 20.0  ;;  %s1669_s22 = sld [smem:[#allocation6 + $0x182]] }
  0x78   : > { %v606_v44 = vadd.f32 %v605_v27, %v602_v36  ;;  %v639_v46 = vmax.f32 %v592_v35, -30.0  ;;  %v512_v20 = vadd.f32 %v1530_v29, %v1535_v33  ;;  %v530_v21 = vadd.f32 %v529_v31, %v526_v30  ;;  %v464_v27 = vld [vmem:[%s1650_s9 + $0x8] sm:$0xff] }
  0x79   : > { %v533_v24 = vmul.f32 %v532_v32, %v1488_v13  ;;  %v614_v25 = vmul.f32 1.442695, %v613_v38  ;;  %v536_v47 = vstv %s1579_s3  ;;  %v626_v49 = vmul.f32 0.5, %v1604_v45 }
  0x7a   : > { %v610_v48 = vadd.f32 %v609_v39, %v606_v44  ;;  %v1619_v50 = vmin.f32 %v639_v46, 20.0  ;;  %v480_v29 = vadd.f32 %v1499_v17, %v1496_v16  ;;  %v483_v33 = vmul.f32 %v482_v14, %v1527_v28 }
  0x7b   : > { %v501_v51 = vmul.f32 %v500_v22, %v1527_v28  ;;  %1175 = vpow2.f32 %v614_v25  ;;  %v498_v52 = vadd.f32 %v497_v42, %v494_v41  ;;  %v627_v53 = vmul.f32 1.442695, %v626_v49 }
  0x7c   : > { %v641_v54 = vmul.f32 0.5, %v1619_v50  ;;  %v654_v55 = vmax.f32 %v610_v48, -30.0  ;;  %v516_v16 = vadd.f32 %v515_v37, %v512_v20  ;;  %v519_v17 = vmul.f32 %v518_v43, %v1527_v28  ;;  %v465_v37 = vld [vmem:[%s1650_s9 + $0x10] sm:$0xff] }
  0x7d   : > { %v534_v14 = vadd.f32 %v533_v24, %v530_v21  ;;  %v537_v56 = vmul.f32 %v536_v47, %v1527_v28  ;;  %1177 = vpow2.f32 %v627_v53  ;;  %v484_v58 = vadd.f32 %v483_v33, %v480_v29 }
  0x7e   : > { %v642_v22 = vmul.f32 1.442695, %v641_v54  ;;  %v1652_v57 = vmin.f32 %v654_v55, 20.0  ;;  %v502_v59 = vadd.f32 %v501_v51, %v498_v52  ;;  %v520_v61 = vadd.f32 %v519_v17, %v516_v16  ;;  %v466_v55 = vld [vmem:[%s1650_s9 + $0x18] sm:$0xff] }
  0x7f   : > { %v1665_v62 = vadd.f32 %v537_v56, %v534_v14  ;;  %v619_v63 = vmul.f32 %v484_v58, %v484_v58  ;;  %v761_v3 = vlaneseq  ;;  %v670_v8 = vstv %s1601_s4  ;;  %s1692_s4 = scalar_lea.vmem %s1750_s6, %s1424_s19 }
  0x80   : > { %1179 = vpow2.f32 %v642_v22  ;;  %v656_v60 = vmul.f32 0.5, %v1652_v57  ;;  %v633_v0 = vmul.f32 %v502_v59, %v502_v59  ;;  %v648_v6 = vmul.f32 %v520_v61, %v520_v61 }
  0x81   : > { %v1674_v7 = vmul.f32 %v1665_v62, %v1665_v62  ;;  %v673_v9 = vstv %s1606_s28  ;;  %v676_v10 = vstv %s1608_s14  ;;  %v680_v11 = vstv %s1613_s10  ;;  %s1704_s28 = sld [smem:[#allocation6 + $0x183]] }
  0x82   : > { %v657_v2 = vmul.f32 1.442695, %v656_v60  ;;  %v684_v12 = vstv %s1615_s17  ;;  %v691_v18 = vstv %s1621_s23  ;;  %v694_v19 = vstv %s1623_s18  ;;  %s451_s23 = scalar_lea.vmem %s1751_s7, %s1424_s19  ;;  %s1035_s19 = sshll.u32 %s1780_s27, 3 }
  0x83   : > { %v697_v23 = vstv %s1633_s20  ;;  %v701_v26 = vstv %s1635_s21  ;;  %v705_v32 = vstv %s1638_s24  ;;  %v714_v35 = vstv %s1642_s25  ;;  %s458_s20 = scalar_lea.vmem %s1752_s8, %s1035_s19 }
  0x84   : > { %1181 = vpow2.f32 %v657_v2  ;;  %v717_v36 = vstv %s1644_s11  ;;  %v720_v39 = vstv %s1654_s15  ;;  %v724_v40 = vstv %s1656_s16 }
  0x85   : > { %v1176_v15 = vpop.eup %1175  ;;  %v728_v41 = vstv %s1658_s12  ;;  %v737_v44 = vstv %s1661_s0  ;;  %v740_v46 = vstv %s1663_s1  ;;  %v743_v24 = vstv %s1667_s13 }
  0x86   : > { %v616_v30 = vmul.f32 %v1176_v15, %v463_v4  ;;  %v620_v31 = vmul.f32 %v1176_v15, %v1176_v15  ;;  %v747_v25 = vstv %s1669_s22 }
  0x87   : > { %v1178_v42 = vpop.eup %1177 }
  0x88   : > { %v617_v38 = vadd.f32 %v616_v30, %v484_v58  ;;  %v621_v43 = vadd.f32 %v620_v31, %v619_v63  ;;  %v629_v20 = vmul.f32 %v1178_v42, %v464_v27  ;;  %v634_v21 = vmul.f32 %v1178_v42, %v1178_v42 }
  0x8a   : > { %v1180_v47 = vpop.eup %1179  ;;  %618 = vst [vmem:[%s1692_s4] sm:$0xff] %v617_v38  ;;  %v1074_v48 = vadd.f32 -1.0, %v621_v43  ;;  %v671_v49 = vmul.f32 %v670_v8, %v617_v38  ;;  %v692_v29 = vmul.f32 %v691_v18, %v617_v38  ;;  %v715_v33 = vmul.f32 %v714_v35, %v617_v38 }
  0x8b   : > { %v630_v51 = vadd.f32 %v629_v20, %v502_v59  ;;  %v635_v52 = vadd.f32 %v634_v21, %v633_v0  ;;  %v644_v53 = vmul.f32 %v1180_v47, %v465_v37  ;;  %v649_v54 = vmul.f32 %v1180_v47, %v1180_v47 }
  0x8c   : > { %v623_v16 = vsub.f32 %v1074_v48, %v1589_v34  ;;  %v674_v17 = vadd.f32 %v673_v9, %v671_v49  ;;  %v695_v14 = vadd.f32 %v694_v19, %v692_v29  ;;  %v718_v56 = vadd.f32 %v717_v36, %v715_v33 }
  0x8d   : > { %1075 = vst [vmem:[%s1692_s4 + $0x8] sm:$0xff] %v630_v51  ;;  %v1076_v22 = vadd.f32 -1.0, %v635_v52  ;;  %v645_v58 = vadd.f32 %v644_v53, %v520_v61  ;;  %v650_v60 = vadd.f32 %v649_v54, %v648_v6  ;;  %v677_v63 = vmul.f32 %v676_v10, %v630_v51 }
  0x8e   : > { %v1182_v2 = vpop.eup %1181  ;;  %v698_v4 = vmul.f32 %v697_v23, %v630_v51  ;;  %v721_v59 = vmul.f32 %v720_v39, %v630_v51  ;;  %v738_v0 = vmul.f32 %v737_v44, %v617_v38  ;;  %v744_v8 = vmul.f32 %v743_v24, %v630_v51 }
  0x8f   : > { %v637_v15 = vsub.f32 %v1076_v22, %v1604_v45  ;;  %1077 = vst [vmem:[%s1692_s4 + $0x10] sm:$0xff] %v645_v58  ;;  %v1078_v18 = vadd.f32 -1.0, %v650_v60  ;;  %v659_v27 = vmul.f32 %v1182_v2, %v466_v55  ;;  %v664_v34 = vmul.f32 %v1182_v2, %v1182_v2 }
  0x90   : > { %v678_v9 = vadd.f32 %v677_v63, %v674_v17  ;;  %v681_v19 = vmul.f32 %v680_v11, %v645_v58  ;;  %v699_v61 = vadd.f32 %v698_v4, %v695_v14  ;;  %v702_v6 = vmul.f32 %v701_v26, %v645_v58 }
  0x91   : > { %v638_v10 = vadd.f32 %v637_v15, %v623_v16  ;;  %v652_v23 = vsub.f32 %v1078_v18, %v1619_v50  ;;  %v660_v30 = vadd.f32 %v659_v27, %v1665_v62  ;;  %v665_v45 = vadd.f32 %v664_v34, %v1674_v7 }
  0x92   : > { %v682_v31 = vadd.f32 %v681_v19, %v678_v9  ;;  %v703_v35 = vadd.f32 %v702_v6, %v699_v61  ;;  %v722_v36 = vadd.f32 %v721_v59, %v718_v56  ;;  %v725_v39 = vmul.f32 %v724_v40, %v645_v58 }
  0x93   : > { %1079 = vst [vmem:[%s1692_s4 + $0x18] sm:$0xff] %v660_v30  ;;  %v1080_v42 = vadd.f32 -1.0, %v665_v45  ;;  %v685_v37 = vmul.f32 %v684_v12, %v660_v30  ;;  %v706_v11 = vmul.f32 %v705_v32, %v660_v30  ;;  %v751_v38 = vstv %s1704_s28 }
  0x94   : > { %v726_v50 = vadd.f32 %v725_v39, %v722_v36  ;;  %v729_v26 = vmul.f32 %v728_v41, %v660_v30  ;;  %v741_v62 = vadd.f32 %v740_v46, %v738_v0  ;;  %v748_v43 = vmul.f32 %v747_v25, %v645_v58 }
  0x95   : > { %v653_v7 = vadd.f32 %v652_v23, %v638_v10  ;;  %v686_v44 = vadd.f32 %v685_v37, %v682_v31  ;;  %v707_v20 = vadd.f32 %v706_v11, %v703_v35  ;;  %v762_v40 = vshrl.u32 %v761_v3, 7 }
  0x96   : > { %v667_v21 = vsub.f32 %v1080_v42, %v1652_v57  ;;  %v730_v24 = vadd.f32 %v729_v26, %v726_v50  ;;  %v745_v12 = vadd.f32 %v744_v8, %v741_v62  ;;  %v752_v47 = vmul.f32 %v751_v38, %v660_v30 }
  0x97   : > { %687 = vst [vmem:[%s451_s23] sm:$0xff] %v686_v44  ;;  %v688_v32 = vsub.f32 %v686_v44, %v1443_v1  ;;  %1089 = vst [vmem:[%s451_s23 + $0x8] sm:$0xff] %v707_v20  ;;  %v710_v48 = vsub.f32 %v707_v20, %v1463_v5  ;;  %v764_v29 = vand.u32 127, %v761_v3  ;;  %v768_v33 = vmul.u32 128, %v762_v40 }
  0x98   : > { %1095 = vst [vmem:[%s451_s23 + $0x10] sm:$0xff] %v730_v24  ;;  %v733_v41 = vsub.f32 %v730_v24, %v1488_v13  ;;  %v749_v46 = vadd.f32 %v748_v43, %v745_v12  ;;  %v668_v51 = vadd.f32 %v667_v21, %v653_v7 }
  0x99   : > { %v689_v25 = vmul.f32 %v688_v32, %v688_v32  ;;  %v711_v49 = vmul.f32 %v710_v48, %v710_v48  ;;  %v769_v55 = vadd.s32 %v768_v33, %v764_v29 }
  0x9a   : > { %v734_v57 = vmul.f32 %v733_v41, %v733_v41  ;;  %v753_v52 = vadd.f32 %v752_v47, %v749_v46  ;;  %v759_v16 = vmul.f32 0.5, %v668_v51 }
  0x9b   : > { %v712_v53 = vadd.f32 %v711_v49, %v689_v25  ;;  %vm770_vm0 = vcmp.lt.s32.totalorder %v769_v55, 256 }
  0x9c   : > { %1101 = vst [vmem:[%s451_s23 + $0x18] sm:$0xff] %v753_v52  ;;  %v756_v54 = vsub.f32 %v753_v52, %v1527_v28 }
  0x9d   : > { %v735_v1 = vadd.f32 %v734_v57, %v712_v53 }
  0x9e   : > { %v757_v5 = vmul.f32 %v756_v54, %v756_v54 }
  0xa0   : > { %v758_v17 = vadd.f32 %v757_v5, %v735_v1 }
  0xa2   : > { %v760_v13 = vadd.f32 %v759_v16, %v758_v17 }
  0xa4   : > { %v771_v14 = vsel %vm770_vm0, %v760_v13, 0.0 }
  0xa5   : > { %772 = vadd.xlane.f32.xlu0 %v771_v14 }
 0x132   : > { %v773_v56 = vpop.xlane.xlu0 %772 }
 0x133   : > { %v774_v3 = vrot.slane %v773_v56, 4 }
 0x135   : > { %v775_v22 = vadd.f32 %v774_v3, %v773_v56 }
 0x137   : > { %v776_v58 = vrot.slane %v775_v22, 2 }
 0x139   : > { %v777_v60 = vadd.f32 %v776_v58, %v775_v22 }
 0x13b   : > { %v778_v63 = vrot.slane %v777_v60, 1 }
 0x13d   : > { %v779_v2 = vadd.f32 %v778_v63, %v777_v60 }
 0x13f   : > { %1108 = vpush %v779_v2 }
 0x170   : > { %s1109_s21 = spop %1108 }
 0x171   : > { %v781_v28 = vstv %s1109_s21 }
 0x172   : > { %782 = vst [vmem:[%s458_s20] sm:$0xff] %v781_v28 }
 0x173 PF: > { %s22_s29 = sadd.s32 1, %s1277_s29   ;;  %s1775_s27 = sld [smem:[#allocation12_spill]] }
 0x174   : > { %p19_p8 = scmp.ge.s32.totalorder %s22_s29, 4   ;;  %s1776_s28 = sld [smem:[#allocation13_spill]] }
 0x176   :  { %21 = sbr.rel (!%p19_p8) target bundleno = 10 (0xa), region = 124 }
 0x17d   :  { %852 = vsyncpa [#allocation3], 1 }
 0x17e   :  { %854 = vsyncpa [#allocation3 + $0x1], 1 }
 0x17f   :  { %855 = vsyncpa [#allocation5], 1 }
 0x180   :  { %856 = vsyncpa [#allocation8], 1 }

</bundles_post_ra>
